<compile_context>
chip_gen: v6e
topology: v6e:2x2x1
jax: 0.10.0
libtpu: 0.0.40
codegen_flags: <defaults>
</compile_context>

<pallas_src>
import functools

import jax
import jax.numpy as jnp
from jax.experimental import pallas as pl
from jax.experimental.pallas import tpu as pltpu


def _round_up(n: int, m: int) -> int:
    return ((n + m - 1) // m) * m


def mlp_kernel(x_ref, w1_ref, b1_ref, w2_ref, b2_ref, w3_ref, b3_ref, o_ref,
               *, chunk: int):
    """One grid step. x_ref: (23, TB) batch-on-lanes tile; o_ref: (1, TB).

    Weights are in PyTorch layout (out_features, in_features); biases are
    (out_features, 1) columns so they broadcast along the lane (batch) axis.
    """
    w1 = w1_ref[...]        # (64, 23)
    b1 = b1_ref[...]        # (64, 1)
    w2 = w2_ref[...]        # (32, 64)
    b2 = b2_ref[...]        # (32, 1)
    w3 = w3_ref[...]        # (1, 32)
    b3 = b3_ref[...]        # (1, 1)

    tb = x_ref.shape[-1]
    # Static lane-chunk loop keeps h1/h2 at (64, CH)/(32, CH) -> 8/4 vregs each,
    # well inside the 64-vreg file (no spills to VMEM).
    for c in range(tb // chunk):
        sl = pl.ds(c * chunk, chunk)
        xc = x_ref[:, sl]                                            # (23, CH)
        h1 = jnp.dot(w1, xc, preferred_element_type=jnp.float32) + b1
        h1 = jnp.maximum(h1, 0.0)                                    # (64, CH)
        h2 = jnp.dot(w2, h1, preferred_element_type=jnp.float32) + b2
        h2 = jnp.maximum(h2, 0.0)                                    # (32, CH)
        # Final 32 -> 1 layer, N = CH (lane-dense). Kept on the MXU so its
        # numerics match the jnp reference exactly; a VPU multiply + sublane
        # reduce (XLU) is an equivalent alternative that frees the MXU.
        out = jnp.dot(w3, h2, preferred_element_type=jnp.float32) + b3
        o_ref[:, sl] = out.astype(o_ref.dtype)                       # (1, CH)


def mlp_forward(x, params, *, tb: int = 512, chunk: int = 128):
    """x: (B, 23) float32 -> (B, 1) float32. Params in PyTorch layout."""
    w1, b1, w2, b2, w3, b3 = params
    B, in_features = x.shape
    assert in_features == 23

    # Don't over-pad tiny batches; keep TB a multiple of the lane chunk.
    tb = min(tb, _round_up(max(B, 1), chunk))
    tb = _round_up(tb, chunk)
    bp = _round_up(max(B, 1), tb)

    # Batch on lanes: (23, Bp); zero-pad the tail (sliced off below).
    x_t = jnp.zeros((in_features, bp), x.dtype).at[:, :B].set(x.T)

    # Biases as (out, 1) columns so they broadcast along the lane axis.
    b1c = b1.reshape(-1, 1)
    b2c = b2.reshape(-1, 1)
    b3c = b3.reshape(-1, 1)

    kernel = functools.partial(mlp_kernel, chunk=chunk)
    const = lambda i: (0, 0)   # parameters: single block, resident across steps

    out_t = pl.pallas_call(
        kernel,
        out_shape=jax.ShapeDtypeStruct((1, bp), jnp.float32),
        grid=(bp // tb,),
        in_specs=[
            pl.BlockSpec((in_features, tb), lambda i: (0, i)),   # x tile
            pl.BlockSpec(w1.shape, const),                       # (64, 23)
            pl.BlockSpec(b1c.shape, const),                      # (64, 1)
            pl.BlockSpec(w2.shape, const),                       # (32, 64)
            pl.BlockSpec(b2c.shape, const),                      # (32, 1)
            pl.BlockSpec(w3.shape, const),                       # (1, 32)
            pl.BlockSpec(b3c.shape, const),                      # (1, 1)
        ],
        out_specs=pl.BlockSpec((1, tb), lambda i: (0, i)),
        compiler_params=pltpu.CompilerParams(
            dimension_semantics=("parallel",),                   # 2 TCs on v7x
        ),
    )(x_t, w1, b1c, w2, b2c, w3, b3c)

    return out_t[:, :B].T   # (B, 1)


def init_params(key):
    """PyTorch nn.Linear-style init: W (out,in), b (out,), U(±1/sqrt(fan_in))."""
    dims = [(23, 64), (64, 32), (32, 1)]
    params = []
    for fan_in, fan_out in dims:
        key, kw, kb = jax.random.split(key, 3)
        bound = 1.0 / jnp.sqrt(float(fan_in))
        w = jax.random.uniform(kw, (fan_out, fan_in), jnp.float32, -bound, bound)
        b = jax.random.uniform(kb, (fan_out,), jnp.float32, -bound, bound)
        params.extend([w, b])
    return tuple(params)


def mlp_reference(x, params):
    w1, b1, w2, b2, w3, b3 = params
    h1 = jnp.maximum(x @ w1.T + b1, 0.0)
    h2 = jnp.maximum(h1 @ w2.T + b2, 0.0)
    return h2 @ w3.T + b3


if __name__ == "__main__":
    key = jax.random.PRNGKey(0)
    key, kx1, kx2 = jax.random.split(key, 3)
    params = init_params(key)

    # Small shape consistent with the module's (batch, 23) input convention.
    x_small = jax.random.normal(kx1, (8, 23), dtype=jnp.float32)
    out_small = jax.block_until_ready(mlp_forward(x_small, params))
    ref_small = mlp_reference(x_small, params)
    assert out_small.shape == (8, 1)
    assert jnp.allclose(out_small, ref_small, atol=1e-4, rtol=1e-4)

    # Multi-tile + ragged-tail check (B not a multiple of the 512-lane tile).
    x_big = jax.random.normal(kx2, (1037, 23), dtype=jnp.float32)
    out_big = jax.block_until_ready(mlp_forward(x_big, params))
    ref_big = mlp_reference(x_big, params)
    assert out_big.shape == (1037, 1)
    assert jnp.allclose(out_big, ref_big, atol=1e-4, rtol=1e-4)

    print("KERNEL_OK")
</pallas_src>

<mosaic_0001>
module attributes {stable_mosaic.version = 11 : i64} {
  func.func @mlp_kernel(%arg0: i32, %arg1: memref<23x128xf32, #tpu.memory_space<vmem>>, %arg2: memref<64x23xf32, #tpu.memory_space<vmem>>, %arg3: memref<64x1xf32, #tpu.memory_space<vmem>>, %arg4: memref<32x64xf32, #tpu.memory_space<vmem>>, %arg5: memref<32x1xf32, #tpu.memory_space<vmem>>, %arg6: memref<1x32xf32, #tpu.memory_space<vmem>>, %arg7: memref<1x1xf32, #tpu.memory_space<vmem>>, %arg8: memref<1x128xf32, #tpu.memory_space<vmem>>) attributes {dimension_semantics = [#tpu.dimension_semantics<parallel>], iteration_bounds = array<i64: 1>, scalar_prefetch = 0 : i64, scratch_operands = 0 : i64, tpu.core_type = #tpu.core_type<tc>, window_params = [{transform_indices = @transform_0, window_bounds = array<i64: 23, 128>}, {pipeline_mode = #tpu.pipeline_mode<synchronous>, transform_indices = @transform_1, window_bounds = array<i64: 64, 23>}, {pipeline_mode = #tpu.pipeline_mode<synchronous>, transform_indices = @transform_2, window_bounds = array<i64: 64, 1>}, {pipeline_mode = #tpu.pipeline_mode<synchronous>, transform_indices = @transform_3, window_bounds = array<i64: 32, 64>}, {pipeline_mode = #tpu.pipeline_mode<synchronous>, transform_indices = @transform_4, window_bounds = array<i64: 32, 1>}, {pipeline_mode = #tpu.pipeline_mode<synchronous>, transform_indices = @transform_5, window_bounds = array<i64: 1, 32>}, {pipeline_mode = #tpu.pipeline_mode<synchronous>, transform_indices = @transform_6, window_bounds = array<i64: 1, 1>}, {transform_indices = @transform_7, window_bounds = array<i64: 1, 128>}]} {
    %c0 = arith.constant 0 : index
    %c0_0 = arith.constant 0 : index
    %0 = vector.load %arg2[%c0, %c0_0] : memref<64x23xf32, #tpu.memory_space<vmem>>, vector<64x23xf32>
    %c0_1 = arith.constant 0 : index
    %c0_2 = arith.constant 0 : index
    %1 = vector.load %arg3[%c0_1, %c0_2] : memref<64x1xf32, #tpu.memory_space<vmem>>, vector<64x1xf32>
    %c0_3 = arith.constant 0 : index
    %c0_4 = arith.constant 0 : index
    %2 = vector.load %arg4[%c0_3, %c0_4] : memref<32x64xf32, #tpu.memory_space<vmem>>, vector<32x64xf32>
    %c0_5 = arith.constant 0 : index
    %c0_6 = arith.constant 0 : index
    %3 = vector.load %arg5[%c0_5, %c0_6] : memref<32x1xf32, #tpu.memory_space<vmem>>, vector<32x1xf32>
    %c0_7 = arith.constant 0 : index
    %c0_8 = arith.constant 0 : index
    %4 = vector.load %arg6[%c0_7, %c0_8] : memref<1x32xf32, #tpu.memory_space<vmem>>, vector<1x32xf32>
    %c0_9 = arith.constant 0 : index
    %c0_10 = arith.constant 0 : index
    %5 = vector.load %arg7[%c0_9, %c0_10] : memref<1x1xf32, #tpu.memory_space<vmem>>, vector<1x1xf32>
    %c0_11 = arith.constant 0 : index
    %c0_12 = arith.constant 0 : index
    %6 = vector.load %arg1[%c0_11, %c0_12] : memref<23x128xf32, #tpu.memory_space<vmem>>, vector<23x128xf32>
    %cst = arith.constant dense<0.000000e+00> : vector<64x128xf32>
    %7 = tpu.matmul %0, %6, %cst {dimension_numbers = #tpu.dot_dimension_numbers<[1], [0], [0], [1], [0, 0, 1, 1], [], []>} : vector<64x23xf32>, vector<23x128xf32>, vector<64x128xf32> -> vector<64x128xf32>
    %8 = vector.broadcast %1 : vector<64x1xf32> to vector<64x128xf32>
    %9 = arith.addf %7, %8 : vector<64x128xf32>
    %cst_13 = arith.constant 0.000000e+00 : f32
    %10 = vector.broadcast %cst_13 : f32 to vector<64x128xf32>
    %11 = arith.maximumf %9, %10 : vector<64x128xf32>
    %cst_14 = arith.constant dense<0.000000e+00> : vector<32x128xf32>
    %12 = tpu.matmul %2, %11, %cst_14 {dimension_numbers = #tpu.dot_dimension_numbers<[1], [0], [0], [1], [0, 0, 1, 1], [], []>} : vector<32x64xf32>, vector<64x128xf32>, vector<32x128xf32> -> vector<32x128xf32>
    %13 = vector.broadcast %3 : vector<32x1xf32> to vector<32x128xf32>
    %14 = arith.addf %12, %13 : vector<32x128xf32>
    %cst_15 = arith.constant 0.000000e+00 : f32
    %15 = vector.broadcast %cst_15 : f32 to vector<32x128xf32>
    %16 = arith.maximumf %14, %15 : vector<32x128xf32>
    %cst_16 = arith.constant dense<0.000000e+00> : vector<1x128xf32>
    %17 = tpu.matmul %4, %16, %cst_16 {dimension_numbers = #tpu.dot_dimension_numbers<[1], [0], [0], [1], [0, 0, 1, 1], [], []>} : vector<1x32xf32>, vector<32x128xf32>, vector<1x128xf32> -> vector<1x128xf32>
    %18 = vector.broadcast %5 : vector<1x1xf32> to vector<1x128xf32>
    %19 = arith.addf %17, %18 : vector<1x128xf32>
    %c0_17 = arith.constant 0 : index
    %c0_18 = arith.constant 0 : index
    %20 = vector.load %arg8[%c0_17, %c0_18] : memref<1x128xf32, #tpu.memory_space<vmem>>, vector<1x128xf32>
    tpu.vector_store %arg8[%c0_17, %c0_18], %19 {strides = array<i32>} : memref<1x128xf32, #tpu.memory_space<vmem>>, vector<1x128xf32>,
    return
  }
  func.func @transform_0(%arg0: i32) -> (i32, i32) {
    %c0_i32 = arith.constant 0 : i32
    %c0_i32_0 = arith.constant 0 : i32
    return %c0_i32, %arg0 : i32, i32
  }
  func.func @transform_1(%arg0: i32) -> (i32, i32) {
    %c0_i32 = arith.constant 0 : i32
    %c0_i32_0 = arith.constant 0 : i32
    %c0_i32_1 = arith.constant 0 : i32
    return %c0_i32, %c0_i32_0 : i32, i32
  }
  func.func @transform_2(%arg0: i32) -> (i32, i32) {
    %c0_i32 = arith.constant 0 : i32
    %c0_i32_0 = arith.constant 0 : i32
    %c0_i32_1 = arith.constant 0 : i32
    return %c0_i32, %c0_i32_0 : i32, i32
  }
  func.func @transform_3(%arg0: i32) -> (i32, i32) {
    %c0_i32 = arith.constant 0 : i32
    %c0_i32_0 = arith.constant 0 : i32
    %c0_i32_1 = arith.constant 0 : i32
    return %c0_i32, %c0_i32_0 : i32, i32
  }
  func.func @transform_4(%arg0: i32) -> (i32, i32) {
    %c0_i32 = arith.constant 0 : i32
    %c0_i32_0 = arith.constant 0 : i32
    %c0_i32_1 = arith.constant 0 : i32
    return %c0_i32, %c0_i32_0 : i32, i32
  }
  func.func @transform_5(%arg0: i32) -> (i32, i32) {
    %c0_i32 = arith.constant 0 : i32
    %c0_i32_0 = arith.constant 0 : i32
    %c0_i32_1 = arith.constant 0 : i32
    return %c0_i32, %c0_i32_0 : i32, i32
  }
  func.func @transform_6(%arg0: i32) -> (i32, i32) {
    %c0_i32 = arith.constant 0 : i32
    %c0_i32_0 = arith.constant 0 : i32
    %c0_i32_1 = arith.constant 0 : i32
    return %c0_i32, %c0_i32_0 : i32, i32
  }
  func.func @transform_7(%arg0: i32) -> (i32, i32) {
    %c0_i32 = arith.constant 0 : i32
    %c0_i32_0 = arith.constant 0 : i32
    return %c0_i32, %arg0 : i32, i32
  }
}

</mosaic_0001>

<bundles_post_ra>
// kernel: tpu_custom_call.1
= control target key start
LH: loop header
LB: loop body
LE: loop exit
PB: predicated region body
PF: predicated region fallthrough
CT: control target
= control target key end

     0   :  { %s727_s0 = inlined_call_operand.vmem [shape: f32[23,128], index: 0, kind: input, shape index: {}]   ;;  %s728_s1 = inlined_call_operand.vmem [shape: f32[64,23], index: 1, kind: input, shape index: {}]   ;;  %s729_s2 = inlined_call_operand.vmem [shape: f32[64,1], index: 2, kind: input, shape index: {}]   ;;  %s730_s3 = inlined_call_operand.vmem [shape: f32[32,64], index: 3, kind: input, shape index: {}]   ;;  %s731_s4 = inlined_call_operand.vmem [shape: f32[32,1], index: 4, kind: input, shape index: {}]   ;;  %s732_s5 = inlined_call_operand.vmem [shape: f32[1,32], index: 5, kind: input, shape index: {}]   ;;  %s733_s6 = inlined_call_operand.<no memory space> [shape: f32[1,1], index: 6, kind: input, shape index: {}]   ;;  %s734_s7 = inlined_call_operand.hbm [shape: f32[1,128], index: 7, kind: output, shape index: {}]  }
   0x1   :  { %v12_v0 = vstv %s733_s6 }
   0x2   :  { %13 = vst [vmem:[#allocation2] sm:$0x1] %v12_v0 }
   0x3   :  { %v57_v1 = vld [vmem:[%s727_s0 + $0x10] sm:$0x7f]  ;;  %vm123_vm0 = vcmask 1046528   ;;  %v56_v2 = vld [vmem:[%s727_s0 + $0x8] sm:$0xff]  ;;  %vm98_vm1 = vcmask 187392   ;;  %v29_v3 = vld [vmem:[%s728_s1] sm:$0xff] }
   0x4   :  { %502 = vmatprep.subr.msk.mxu0 %vm123_vm0, %v57_v1  ;;  %v55_v4 = vld [vmem:[%s727_s0] sm:$0xff]  ;;  %508 = vmatprep.mubr.msk.f32.mxu0 %vm98_vm1, %v29_v3  ;;  %v581_v5 = vmov 0   ;;  %v44_v6 = vld [vmem:[%s729_s2 + $0x38] sm:$0xff]  ;;  %v30_v7 = vld [vmem:[%s728_s1 + $0x8] sm:$0xff] }
   0x5   :  { %503 = vmatpush3.msk.msra.mxu0 %vm123_vm0, %v57_v1  ;;  %557 = vset.pattern.permute.xlu0 %v581_v5  ;;  %v42_v8 = vld [vmem:[%s729_s2 + $0x28] sm:$0xff]  ;;  %v31_v9 = vld [vmem:[%s728_s1 + $0x10] sm:$0xff]  ;;  %v41_v11 = vld [vmem:[%s729_s2 + $0x20] sm:$0xff] }
   0x6   :  { %504 = vmatprep.subr.mxu0 %v56_v2  ;;  %95 = vperm.xlu0 %557, %v44_v6   ;;  %v43_v10 = vld [vmem:[%s729_s2 + $0x30] sm:$0xff]  ;;  %v32_v12 = vld [vmem:[%s728_s1 + $0x18] sm:$0xff] }
   0x7   :  { %505 = vmatpush3.msra.mxu0 %v56_v2  ;;  %558 = vset.pattern.permute.xlu1 %v581_v5 }
   0x8   :  { %506 = vmatprep.subr.mxu0 %v55_v4  ;;  %85 = vperm.xlu1 %558, %v42_v8  }
   0x9   :  { %507 = vmatpush3.msra.mxu0 %v55_v4 }
   0xa   :  { %509 = vmatmul.mubr.msk.f32.vlgmr.msra.gmra.mxu0 %vm98_vm1, %v30_v7  ;;  %90 = vperm.xlu0 %557, %v43_v10  }
   0xb   :  { %511 = vmatprep.mubr.msk.f32.mxu0 %vm98_vm1, %v31_v9 }
   0xc   :  { %14 = vsyncpa [#allocation4], 0  ;;  %v33_v13 = vld [vmem:[%s728_s1 + $0x20] sm:$0xff]  ;;  %v40_v14 = vld [vmem:[%s729_s2 + $0x18] sm:$0xff]  ;;  %80 = vperm.xlu1 %558, %v41_v11   ;;  %vm260_vm2 = vcmask 523264   ;;  %v582_v62 = vmov 0.0  }
   0xd   :  { %v39_v15 = vld [vmem:[%s729_s2 + $0x10] sm:$0xff]  ;;  %v34_v16 = vld [vmem:[%s728_s1 + $0x28] sm:$0xff]  ;;  %v37_v19 = vld [vmem:[%s729_s2] sm:$0xff]  ;;  %542 = vmatprep.subr.mxu0 %v582_v62  ;;  %vm583_vm3 = vmmov 0   ;;  %vm371_vm4 = vcmask 261120   ;;  %s584_s28 = smov [#allocation3]  }
   0xe   :  { %512 = vmatmul.mubr.msk.f32.gmra.mxu0 %vm98_vm1, %v32_v12  ;;  %75 = vperm.xlu0 %557, %v40_v14   ;;  %v35_v17 = vld [vmem:[%s728_s1 + $0x30] sm:$0xff]  ;;  %v38_v18 = vld [vmem:[%s729_s2 + $0x8] sm:$0xff]  ;;  %v36_v20 = vld [vmem:[%s728_s1 + $0x38] sm:$0xff]  ;;  %s452_s29 = sshll.u32 %s584_s28, 4  ;;  %s453_s29 = int_to_ptr.vmem [resolvable:$true] %s452_s29 }
   0xf   :  { %514 = vmatprep.mubr.msk.f32.mxu0 %vm98_vm1, %v33_v13  ;;  %v52_v21 = vld [vmem:[%s731_s4 + $0x18] sm:$0xff]  ;;  %v51_v22 = vld [vmem:[%s731_s4 + $0x10] sm:$0xff]  ;;  %v50_v23 = vld [vmem:[%s731_s4 + $0x8] sm:$0xff]  ;;  %s559_s30 = scalar_lea.vmem %s453_s29, 16  ;;  %s563_s8 = scalar_lea.vmem %s453_s29, 32 }
  0x10   :  { %70 = vperm.xlu1 %558, %v39_v15   ;;  %v49_v24 = vld [vmem:[%s731_s4] sm:$0xff]  ;;  %v46_v59 = vld [vmem:[%s730_s3 + $0x8] sm:$0xff]  ;;  %v47_v60 = vld [vmem:[%s730_s3 + $0x10] sm:$0xff]  ;;  %p560_p0 = scmp.ne.s32.totalorder %s453_s29, %s559_s30  ;;  %p564_p1 = scmp.lt.s32.totalorder %s453_s29, %s453_s29 }
  0x11   :  { %v54_v25 = vld [vmem:[#allocation2] sm:$0x1]  ;;  %v48_v61 = vld [vmem:[%s730_s3 + $0x18] sm:$0xff]  ;;  %p565_p2 = scmp.lt.s32.totalorder %s563_s8, %s559_s30 }
  0x12   :  { %515 = vmatmul.mubr.msk.f32.gmra.mxu0 %vm98_vm1, %v34_v16  ;;  %65 = vperm.xlu0 %557, %v38_v18   ;;  %v45_v26 = vld [vmem:[%s730_s3] sm:$0xff]  ;;  %v367_v16 = vlaneseq }
  0x13   :  { %517 = vmatprep.mubr.msk.f32.mxu0 %vm98_vm1, %v35_v17  ;;  %536 = vmatprep.mubr.msk.f32.mxu1 %vm260_vm2, %v45_v26  ;;  %v53_v15 = vld [vmem:[%s732_s5] sm:$0x1]  ;;  %p566_p3 = por %p565_p2, %p564_p1 }
  0x14   :  { %60 = vperm.xlu1 %558, %v37_v19   ;;  %v368_v17 = vshrl.u32 %v367_v16, 7 }
  0x15   :  { %p567_p4 = pnand %p566_p3, %p560_p0 }
  0x16   :  { %518 = vmatmul.mubr.msk.f32.gmra.mxu0 %vm98_vm1, %v36_v20  ;;  %257 = vperm.xlu0 %557, %v52_v21   ;;  %v369_v18 = vsub.s32 0, %v368_v17 }
  0x17   :  { %550 = vmatprep.mubr.msk.f32.mxu0 %vm583_vm3, %v582_v62 }
  0x18   :  { %252 = vperm.xlu1 %558, %v51_v22  }
  0x1a   :  { %247 = vperm.xlu0 %557, %v50_v23  }
  0x1c   :  { %242 = vperm.xlu1 %558, %v49_v24  }
  0x1e   :  { %364 = vperm.xlu0 %557, %v54_v25  }
  0x81   :  { %v96_v29 = vpop.permute.xlu0 %95 }
  0x83   :  { %v86_v30 = vpop.permute.xlu1 %85 }
  0x85   :  { %v91_v34 = vpop.permute.xlu0 %90 }
  0x87   :  { %v81_v35 = vpop.permute.xlu1 %80 }
  0x89   :  { %v76_v43 = vpop.permute.xlu0 %75 }
  0x8b   :  { %v71_v44 = vpop.permute.xlu1 %70 }
  0x8d   :  { %v66_v51 = vpop.permute.xlu0 %65 }
  0x8f   :  { %v61_v52 = vpop.permute.xlu1 %60 }
  0x91   :  { %v258_v63 = vpop.permute.xlu0 %257 }
  0x93   :  { %v253_v1 = vpop.permute.xlu1 %252 }
  0x95   :  { %v248_v5 = vpop.permute.xlu0 %247 }
  0x97   :  { %v243_v10 = vpop.permute.xlu1 %242 }
  0x99   :  { %v365_v19 = vpop.permute.xlu0 %364 }
  0x9a   :  { %v370_v20 = vrot.slane %v365_v19, %v369_v18 }
  0xca   :  { %v510_v27 = vpop.f32.mrf.mxu0 }
  0xcb   :  { %v199_v53 = vadd.f32 %v510_v27, %v66_v51 }
  0xcc   :  { %v193_v28 = vpop.f32.mrf.mxu0 }
  0xcd   :  { %v194_v55 = vadd.f32 %v193_v28, %v61_v52  ;;  %v233_v57 = vmax.f32 %v199_v53, 0.0 }
  0xce   :  { %v513_v31 = vpop.f32.mrf.mxu0 }
  0xcf   :  { %v209_v47 = vadd.f32 %v513_v31, %v76_v43  ;;  %v232_v58 = vmax.f32 %v194_v55, 0.0 }
  0xd0   :  { %v203_v32 = vpop.f32.mrf.mxu0 }
  0xd1   :  { %v204_v49 = vadd.f32 %v203_v32, %v71_v44  ;;  %v235_v54 = vmax.f32 %v209_v47, 0.0 }
  0xd2   :  { %v516_v33 = vpop.f32.mrf.mxu0 }
  0xd3   :  { %v219_v40 = vadd.f32 %v516_v33, %v86_v30  ;;  %v234_v56 = vmax.f32 %v204_v49, 0.0 }
  0xd4   :  { %v213_v36 = vpop.f32.mrf.mxu0 }
  0xd5   :  { %v214_v45 = vadd.f32 %v213_v36, %v81_v35  ;;  %v237_v48 = vmax.f32 %v219_v40, 0.0 }
  0xd6   :  { %v519_v37 = vpop.f32.mrf.mxu0 }
  0xd7   :  { %v229_v38 = vadd.f32 %v519_v37, %v96_v29  ;;  %v236_v50 = vmax.f32 %v214_v45, 0.0 }
  0xd8   :  { %v223_v39 = vpop.f32.mrf.mxu0 }
  0xd9   :  { %v239_v41 = vmax.f32 %v229_v38, 0.0  ;;  %v224_v42 = vadd.f32 %v223_v39, %v91_v34 }
  0xdb   :  { %v238_v46 = vmax.f32 %v224_v42, 0.0  ;;  %520 = vmatprep.subr.mxu1 %v239_v41 }
  0xdc   :  { %521 = vmatpush3.msra.mxu1 %v239_v41 }
  0xdd   :  { %522 = vmatprep.subr.mxu1 %v238_v46 }
  0xde   :  { %523 = vmatpush3.msra.mxu1 %v238_v46 }
  0xdf   :  { %524 = vmatprep.subr.mxu1 %v237_v48 }
  0xe0   :  { %525 = vmatpush3.msra.mxu1 %v237_v48 }
  0xe1   :  { %526 = vmatprep.subr.mxu1 %v236_v50 }
  0xe2   :  { %527 = vmatpush3.msra.mxu1 %v236_v50 }
  0xe3   :  { %528 = vmatprep.subr.mxu1 %v235_v54 }
  0xe4   :  { %529 = vmatpush3.msra.mxu1 %v235_v54 }
  0xe5   :  { %530 = vmatprep.subr.mxu1 %v234_v56 }
  0xe6   :  { %531 = vmatpush3.msra.mxu1 %v234_v56 }
  0xe7   :  { %532 = vmatprep.subr.mxu1 %v233_v57 }
  0xe8   :  { %533 = vmatpush3.msra.mxu1 %v233_v57 }
  0xe9   :  { %534 = vmatprep.subr.mxu1 %v232_v58 }
  0xea   :  { %535 = vmatpush3.msra.mxu1 %v232_v58 }
  0xeb   :  { %537 = vmatmul.mubr.msk.f32.vlgmr.msra.gmra.mxu1 %vm260_vm2, %v46_v59 }
  0xec   :  { %539 = vmatprep.mubr.msk.f32.mxu1 %vm260_vm2, %v47_v60 }
  0xef   :  { %540 = vmatmul.mubr.msk.f32.gmra.mxu1 %vm260_vm2, %v48_v61 }
 0x1ab   :  { %v538_v0 = vpop.f32.mrf.mxu1 }
 0x1ac   :  { %v345_v7 = vadd.f32 %v538_v0, %v248_v5 }
 0x1ad   :  { %v339_v2 = vpop.f32.mrf.mxu1 }
 0x1ae   :  { %v340_v11 = vadd.f32 %v339_v2, %v243_v10  ;;  %v359_v13 = vmax.f32 %v345_v7, 0.0 }
 0x1af   :  { %v541_v3 = vpop.f32.mrf.mxu1 }
 0x1b0   :  { %v355_v4 = vadd.f32 %v541_v3, %v258_v63  ;;  %v358_v14 = vmax.f32 %v340_v11, 0.0 }
 0x1b1   :  { %v349_v6 = vpop.f32.mrf.mxu1 }
 0x1b2   :  { %v361_v8 = vmax.f32 %v355_v4, 0.0  ;;  %v350_v9 = vadd.f32 %v349_v6, %v253_v1 }
 0x1b4   :  { %v360_v12 = vmax.f32 %v350_v9, 0.0  ;;  %543 = vmatpush3.msra.mxu0 %v361_v8 }
 0x1b5   :  { %544 = vmatprep.subr.mxu0 %v582_v62 }
 0x1b6   :  { %545 = vmatpush3.msra.mxu0 %v360_v12 }
 0x1b7   :  { %546 = vmatprep.subr.mxu0 %v582_v62 }
 0x1b8   :  { %547 = vmatpush3.msra.mxu0 %v359_v13 }
 0x1b9   :  { %548 = vmatprep.subr.mxu0 %v582_v62 }
 0x1ba   :  { %549 = vmatpush3.msra.mxu0 %v358_v14 }
 0x1bb   :  { %551 = vmatmul.mubr.msk.f32.vlgmr.msra.gmra.mxu0 %vm371_vm4, %v53_v15 }
 0x27b   :  { %v441_v21 = vpop.f32.mrf.mxu0 }
 0x27c   :  { %v442_v22 = vadd.f32 %v441_v21, %v370_v20 }
 0x27d   :  { %v552_v23 = vpop.f32.mrf.mxu0 }
 0x27e   :  { %445 = vst [vmem:[#allocation3] sm:$0x1] %v442_v22 }
 0x27f   :  { %570 = shalt.err (!%p567_p4)
}
 0x280   :  { %455 = dma.vmem_to_hbm [thread:$0]  %s453_s29, 16, %s734_s7, [#allocation4]  }
 0x281   :  { %579 = dma.done.wait [#allocation4], 16  }
 0x282   :  { %580 = vsyncadd [#allocation4], 4294967280 }
 0x283   :  { %459 = vsyncpa [#allocation4], 1 }

</bundles_post_ra>
